<compile_context>
chip_gen: v5e
topology: v5e:2x2
jax: 0.10.0
libtpu: 0.0.40
codegen_flags: <defaults>
</compile_context>

<pallas_src>
import functools
import math

import numpy as np
import jax
import jax.numpy as jnp
from jax.experimental import pallas as pl
from jax.experimental.pallas import tpu as pltpu


# ----------------------------------------------------------------------------
# Pallas kernels
# ----------------------------------------------------------------------------

def _softplus(y):
    # numerically stable softplus (matches F.softplus up to f32 precision);
    # 1 + exp(-|y|) is in [1, 2] so a plain log is already full-precision here.
    return jnp.maximum(y, 0.0) + jnp.log(1.0 + jnp.exp(-jnp.abs(y)))


def _feature_readout_kernel(x_ref, wf_ref, bf_ref,
                            w1_ref, b1_ref, w2_ref, b2_ref,
                            w3_ref, b3_ref, w4_ref, b4_ref, o_ref):
    """Fused feature backbone (ReLU) + readout network (softplus x3, linear) on one tile."""
    h = jnp.dot(x_ref[...], wf_ref[...], preferred_element_type=jnp.float32) + bf_ref[...]
    h = jnp.maximum(h, 0.0)                                                   # feature ReLU
    h = _softplus(jnp.dot(h, w1_ref[...], preferred_element_type=jnp.float32) + b1_ref[...])
    h = _softplus(jnp.dot(h, w2_ref[...], preferred_element_type=jnp.float32) + b2_ref[...])
    h = _softplus(jnp.dot(h, w3_ref[...], preferred_element_type=jnp.float32) + b3_ref[...])
    o_ref[...] = jnp.dot(h, w4_ref[...], preferred_element_type=jnp.float32) + b4_ref[...]


def _finalize_kernel(r_ref, a_ref, bt_ref, cb_ref, wcb_ref, o_ref, *, log_extra, normalize):
    """Per-batch: (nearest upsample + gaussian smooth) via folded matrices, + weighted
    center bias, + (optionally) log-density normalization at the small resolution."""
    r = r_ref[0]                                                              # (rh, rw)
    up = jnp.dot(a_ref[...], r, preferred_element_type=jnp.float32)          # (Hs, rw)
    sm = jnp.dot(up, bt_ref[...], preferred_element_type=jnp.float32)        # (Hs, Ws)
    s = sm + wcb_ref[...] * cb_ref[0]                                         # (1,1) broadcast
    if normalize:
        m = jnp.max(s)
        lse = m + jnp.log(jnp.sum(jnp.exp(s - m)))
        s = s - (lse + log_extra)
    o_ref[0] = s


def _log_density_kernel(x_ref, o_ref):
    """Per-batch x - logsumexp(x) over the spatial plane (fallback, full resolution)."""
    x = x_ref[0]
    m = jnp.max(x)
    s = jnp.sum(jnp.exp(x - m))
    o_ref[0] = x - (m + jnp.log(s))


# ----------------------------------------------------------------------------
# Pallas wrappers
# ----------------------------------------------------------------------------

def fused_feature_readout(xm, layers):
    """xm: (M, Cin) rows of the (tiny) readout-resolution image; layers: list of (w, b)."""
    M, _ = xm.shape
    (wf, bf), (w1, b1), (w2, b2), (w3, b3), (w4, b4) = layers
    args = [xm,
            wf, bf.reshape(1, -1),
            w1, b1.reshape(1, -1),
            w2, b2.reshape(1, -1),
            w3, b3.reshape(1, -1),
            w4, b4.reshape(1, -1)]
    cout = w4.shape[1]
    in_specs = [pl.BlockSpec(tuple(a.shape), lambda i: (0, 0)) for a in args]
    return pl.pallas_call(
        _feature_readout_kernel,
        out_shape=jax.ShapeDtypeStruct((M, cout), jnp.float32),
        grid_spec=pltpu.PrefetchScalarGridSpec(
            num_scalar_prefetch=0,
            grid=(1,),
            in_specs=in_specs,
            out_specs=pl.BlockSpec((M, cout), lambda i: (0, 0)),
        ),
        compiler_params=pltpu.CompilerParams(dimension_semantics=("arbitrary",)),
    )(*args)


def finalize(r, A, Bt, ds_cb, wcb, *, log_extra, normalize):
    """r: (B, rh, rw) readout; A: (Hs, rh); Bt: (rw, Ws); ds_cb: (B, Hs, Ws)."""
    B, rh, rw = r.shape
    Hs, Ws = ds_cb.shape[1], ds_cb.shape[2]
    wcb_arr = jnp.reshape(wcb, (1, 1)).astype(jnp.float32)
    kernel = functools.partial(_finalize_kernel,
                               log_extra=float(log_extra), normalize=bool(normalize))
    return pl.pallas_call(
        kernel,
        out_shape=jax.ShapeDtypeStruct((B, Hs, Ws), jnp.float32),
        grid_spec=pltpu.PrefetchScalarGridSpec(
            num_scalar_prefetch=0,
            grid=(B,),
            in_specs=[
                pl.BlockSpec((1, rh, rw), lambda b: (b, 0, 0)),
                pl.BlockSpec((Hs, rh), lambda b: (0, 0)),
                pl.BlockSpec((rw, Ws), lambda b: (0, 0)),
                pl.BlockSpec((1, Hs, Ws), lambda b: (b, 0, 0)),
                pl.BlockSpec((1, 1), lambda b: (0, 0)),
            ],
            out_specs=pl.BlockSpec((1, Hs, Ws), lambda b: (b, 0, 0)),
        ),
        compiler_params=pltpu.CompilerParams(dimension_semantics=("parallel",)),
    )(r, A, Bt, ds_cb, wcb_arr)


def log_density(x):
    """x: (B, H, W) -> x - logsumexp over (H, W) per batch (general fallback path)."""
    B, H, W = x.shape
    return pl.pallas_call(
        _log_density_kernel,
        out_shape=jax.ShapeDtypeStruct((B, H, W), jnp.float32),
        grid_spec=pltpu.PrefetchScalarGridSpec(
            num_scalar_prefetch=0,
            grid=(B,),
            in_specs=[pl.BlockSpec((1, H, W), lambda b: (b, 0, 0))],
            out_specs=pl.BlockSpec((1, H, W), lambda b: (b, 0, 0)),
        ),
        compiler_params=pltpu.CompilerParams(dimension_semantics=("parallel",)),
    )(x)


# ----------------------------------------------------------------------------
# JAX glue: nearest interpolation, gaussian matrices, parameter init
# ----------------------------------------------------------------------------

def nearest_resize_hw(x, out_h, out_w):
    """F.interpolate(mode='nearest') over the last two dims (PyTorch index rule)."""
    H, W = x.shape[-2], x.shape[-1]
    idx_h = (jnp.arange(out_h) * H) // out_h
    idx_w = (jnp.arange(out_w) * W) // out_w
    x = jnp.take(x, idx_h, axis=-2)
    x = jnp.take(x, idx_w, axis=-1)
    return x


def _compose_nearest_idx(n_src, n_mid, n_out):
    """Indices of nearest-resize n_src -> n_mid followed by n_mid -> n_out (composed)."""
    idx1 = (np.arange(n_mid) * n_src) // n_mid
    idx2 = (np.arange(n_out) * n_mid) // n_out
    return jnp.asarray(idx1[idx2])


def gaussian_smoothing_matrix_np(n, sigma, truncate):
    """Dense (n, n) matrix equivalent to a 1D gaussian conv with replicate padding
    (matches GaussianFilterNd: kernel_size = 2*ceil(truncate*sigma)+1, normalized)."""
    radius = int(math.ceil(truncate * sigma))
    ks = 2 * radius + 1
    grid = np.arange(ks, dtype=np.float64) - (ks - 1) / 2.0
    k = np.exp(-0.5 * (grid / sigma) ** 2)
    k = k / k.sum()
    G = np.zeros((n, n), dtype=np.float64)
    for i in range(n):
        for t in range(ks):
            j = min(max(i + t - radius, 0), n - 1)
            G[i, j] += k[t]
    return G


def _init_linear(kw, kb, cin, cout):
    w = (jax.random.normal(kw, (cin, cout), dtype=jnp.float32) / math.sqrt(cin))
    b = (jax.random.normal(kb, (cout,), dtype=jnp.float32) * 0.01)
    return w, b


class DeepGazeIIPallas:
    """DeepGazeII with a synthetic (deterministically initialized) frozen feature backbone
    (two 1x1-conv branches, ReLU, concat fused into one conv) and a DeepGazeII-style readout
    network (1x1 convs 16->16->32->2->1 with softplus), followed by the Finalizer."""

    def __init__(self, key, in_channels=3, downsample=2, readout_factor=16,
                 saliency_map_factor=2, initial_sigma=8.0):
        self.downsample = downsample
        self.readout_factor = readout_factor
        self.saliency_map_factor = saliency_map_factor
        self.sigma = float(initial_sigma)
        self.truncate = 3
        self.center_bias_weight = jnp.asarray(1.0, dtype=jnp.float32)

        keys = jax.random.split(key, 12)
        # "features" backbone: two 1x1-conv ReLU branches; concatenation along the output
        # channel commutes with the pointwise ReLU, so fuse into a single (Cin, 16) conv.
        wf1, bf1 = _init_linear(keys[0], keys[1], in_channels, 8)
        wf2, bf2 = _init_linear(keys[2], keys[3], in_channels, 8)
        self.feature_layer = (jnp.concatenate([wf1, wf2], axis=1),
                              jnp.concatenate([bf1, bf2], axis=0))
        # readout network on the concatenated (16-channel) features
        self.readout_layers = [
            _init_linear(keys[4], keys[5], 16, 16),
            _init_linear(keys[6], keys[7], 16, 32),
            _init_linear(keys[8], keys[9], 32, 2),
            _init_linear(keys[10], keys[11], 2, 1),
        ]

    def _smoothing_matrices(self, Hs, Ws, rh, rw):
        """Fold the nearest upsample (rh,rw)->(Hs,Ws) into the separable gaussian matrices."""
        gh = gaussian_smoothing_matrix_np(Hs, self.sigma, self.truncate)   # (Hs, Hs)
        gw = gaussian_smoothing_matrix_np(Ws, self.sigma, self.truncate)   # (Ws, Ws)
        idx_uh = (np.arange(Hs) * rh) // Hs
        idx_uw = (np.arange(Ws) * rw) // Ws
        Uh = (idx_uh[:, None] == np.arange(rh)[None, :]).astype(np.float64)  # (Hs, rh)
        Uw = (idx_uw[:, None] == np.arange(rw)[None, :]).astype(np.float64)  # (Ws, rw)
        A = gh @ Uh                    # (Hs, rh)
        Bt = (gw @ Uw).T               # (rw, Ws)
        return jnp.asarray(A, jnp.float32), jnp.asarray(Bt, jnp.float32)

    def __call__(self, x, centerbias):
        B, C, H, W = x.shape
        H_ds = int(H // self.downsample)
        W_ds = int(W // self.downsample)
        rh = int(math.ceil(H / self.downsample / self.readout_factor))
        rw = int(math.ceil(W / self.downsample / self.readout_factor))

        # The backbone is pointwise (1x1 convs), so the nearest downsample and the nearest
        # resize to the readout grid commute with it exactly; compose both gathers and apply
        # them BEFORE the convs (B*rh*rw rows instead of B*H_ds*W_ds).
        idx_h = _compose_nearest_idx(H, H_ds, rh)
        idx_w = _compose_nearest_idx(W, W_ds, rw)
        x_small = jnp.take(jnp.take(x, idx_h, axis=2), idx_w, axis=3)     # (B, C, rh, rw)
        xm = jnp.transpose(x_small, (0, 2, 3, 1)).reshape(B * rh * rw, C)

        # fused features + readout network (single Pallas launch)
        layers = [self.feature_layer] + self.readout_layers
        r = fused_feature_readout(xm, layers)                             # (B*rh*rw, 1)
        r = r.reshape(B, rh, rw)

        # ---- Finalizer ----
        cb_h, cb_w = centerbias.shape[1], centerbias.shape[2]
        Hs = int(cb_h // self.saliency_map_factor)
        Ws = int(cb_w // self.saliency_map_factor)
        ds_cb = nearest_resize_hw(centerbias, Hs, Ws)                     # (B, Hs, Ws)

        A, Bt = self._smoothing_matrices(Hs, Ws, rh, rw)

        # If the final upsample to (cb_h, cb_w) is an exact integer duplication, normalize
        # at the small resolution: lse_full = lse_small + log(kh * kw).
        exact = (cb_h % Hs == 0) and (cb_w % Ws == 0)
        log_extra = math.log((cb_h // Hs) * (cb_w // Ws)) if exact else 0.0

        out = finalize(r, A, Bt, ds_cb, self.center_bias_weight,
                       log_extra=log_extra, normalize=exact)              # (B, Hs, Ws)

        out = nearest_resize_hw(out, cb_h, cb_w)                          # (B, cb_h, cb_w)
        if not exact:
            out = log_density(out)                                        # general fallback
        return out


# ----------------------------------------------------------------------------
# main
# ----------------------------------------------------------------------------

if __name__ == "__main__":
    key = jax.random.PRNGKey(0)
    k_model, k_x, k_cb = jax.random.split(key, 3)

    B, C, H, W = 2, 3, 128, 128
    x = jax.random.normal(k_x, (B, C, H, W), dtype=jnp.float32)
    centerbias = 0.1 * jax.random.normal(k_cb, (B, H, W), dtype=jnp.float32)

    model = DeepGazeIIPallas(k_model, in_channels=C)
    forward = jax.jit(lambda xx, cb: model(xx, cb))

    out = forward(x, centerbias)
    out = jax.block_until_ready(out)

    assert out.shape == (B, H, W), out.shape
    assert bool(jnp.all(jnp.isfinite(out)))
    # sanity: each map should be a (log-)density, i.e. logsumexp == 0
    lse = jax.scipy.special.logsumexp(out.reshape(B, -1), axis=1)
    assert bool(jnp.all(jnp.abs(lse) < 1e-3)), lse

    print("KERNEL_OK")
</pallas_src>

<mosaic_0001>
module attributes {stable_mosaic.version = 11 : i64} {
  func.func @_feature_readout_kernel(%arg0: i32, %arg1: memref<32x3xf32, #tpu.memory_space<vmem>>, %arg2: memref<3x16xf32, #tpu.memory_space<vmem>>, %arg3: memref<1x16xf32, #tpu.memory_space<vmem>>, %arg4: memref<16x16xf32, #tpu.memory_space<vmem>>, %arg5: memref<1x16xf32, #tpu.memory_space<vmem>>, %arg6: memref<16x32xf32, #tpu.memory_space<vmem>>, %arg7: memref<1x32xf32, #tpu.memory_space<vmem>>, %arg8: memref<32x2xf32, #tpu.memory_space<vmem>>, %arg9: memref<1x2xf32, #tpu.memory_space<vmem>>, %arg10: memref<2x1xf32, #tpu.memory_space<vmem>>, %arg11: memref<1x1xf32, #tpu.memory_space<vmem>>, %arg12: memref<32x1xf32, #tpu.memory_space<vmem>>) attributes {dimension_semantics = [#tpu.dimension_semantics<arbitrary>], iteration_bounds = array<i64: 1>, scalar_prefetch = 0 : i64, scratch_operands = 0 : i64, tpu.core_type = #tpu.core_type<tc>, window_params = [{pipeline_mode = #tpu.pipeline_mode<synchronous>, transform_indices = @transform_0, window_bounds = array<i64: 32, 3>}, {pipeline_mode = #tpu.pipeline_mode<synchronous>, transform_indices = @transform_1, window_bounds = array<i64: 3, 16>}, {pipeline_mode = #tpu.pipeline_mode<synchronous>, transform_indices = @transform_2, window_bounds = array<i64: 1, 16>}, {pipeline_mode = #tpu.pipeline_mode<synchronous>, transform_indices = @transform_3, window_bounds = array<i64: 16, 16>}, {pipeline_mode = #tpu.pipeline_mode<synchronous>, transform_indices = @transform_4, window_bounds = array<i64: 1, 16>}, {pipeline_mode = #tpu.pipeline_mode<synchronous>, transform_indices = @transform_5, window_bounds = array<i64: 16, 32>}, {pipeline_mode = #tpu.pipeline_mode<synchronous>, transform_indices = @transform_6, window_bounds = array<i64: 1, 32>}, {pipeline_mode = #tpu.pipeline_mode<synchronous>, transform_indices = @transform_7, window_bounds = array<i64: 32, 2>}, {pipeline_mode = #tpu.pipeline_mode<synchronous>, transform_indices = @transform_8, window_bounds = array<i64: 1, 2>}, {pipeline_mode = #tpu.pipeline_mode<synchronous>, transform_indices = @transform_9, window_bounds = array<i64: 2, 1>}, {pipeline_mode = #tpu.pipeline_mode<synchronous>, transform_indices = @transform_10, window_bounds = array<i64: 1, 1>}, {pipeline_mode = #tpu.pipeline_mode<synchronous>, transform_indices = @transform_11, window_bounds = array<i64: 32, 1>}]} {
    %c0 = arith.constant 0 : index
    %c0_0 = arith.constant 0 : index
    %0 = vector.load %arg1[%c0, %c0_0] : memref<32x3xf32, #tpu.memory_space<vmem>>, vector<32x3xf32>
    %c0_1 = arith.constant 0 : index
    %c0_2 = arith.constant 0 : index
    %1 = vector.load %arg2[%c0_1, %c0_2] : memref<3x16xf32, #tpu.memory_space<vmem>>, vector<3x16xf32>
    %cst = arith.constant dense<0.000000e+00> : vector<32x16xf32>
    %2 = tpu.matmul %0, %1, %cst {dimension_numbers = #tpu.dot_dimension_numbers<[1], [0], [0], [1], [0, 0, 1, 1], [], []>} : vector<32x3xf32>, vector<3x16xf32>, vector<32x16xf32> -> vector<32x16xf32>
    %c0_3 = arith.constant 0 : index
    %c0_4 = arith.constant 0 : index
    %3 = vector.load %arg3[%c0_3, %c0_4] : memref<1x16xf32, #tpu.memory_space<vmem>>, vector<1x16xf32>
    %4 = vector.broadcast %3 : vector<1x16xf32> to vector<32x16xf32>
    %5 = arith.addf %2, %4 : vector<32x16xf32>
    %cst_5 = arith.constant 0.000000e+00 : f32
    %6 = vector.broadcast %cst_5 : f32 to vector<32x16xf32>
    %7 = arith.maximumf %5, %6 : vector<32x16xf32>
    %c0_6 = arith.constant 0 : index
    %c0_7 = arith.constant 0 : index
    %8 = vector.load %arg4[%c0_6, %c0_7] : memref<16x16xf32, #tpu.memory_space<vmem>>, vector<16x16xf32>
    %cst_8 = arith.constant dense<0.000000e+00> : vector<32x16xf32>
    %9 = tpu.matmul %7, %8, %cst_8 {dimension_numbers = #tpu.dot_dimension_numbers<[1], [0], [0], [1], [0, 0, 1, 1], [], []>} : vector<32x16xf32>, vector<16x16xf32>, vector<32x16xf32> -> vector<32x16xf32>
    %c0_9 = arith.constant 0 : index
    %c0_10 = arith.constant 0 : index
    %10 = vector.load %arg5[%c0_9, %c0_10] : memref<1x16xf32, #tpu.memory_space<vmem>>, vector<1x16xf32>
    %11 = vector.broadcast %10 : vector<1x16xf32> to vector<32x16xf32>
    %12 = arith.addf %9, %11 : vector<32x16xf32>
    %cst_11 = arith.constant 0.000000e+00 : f32
    %13 = vector.broadcast %cst_11 : f32 to vector<32x16xf32>
    %14 = arith.maximumf %12, %13 : vector<32x16xf32>
    %15 = math.absf %12 : vector<32x16xf32>
    %cst_12 = arith.constant 0.000000e+00 : f32
    %16 = vector.broadcast %cst_12 : f32 to vector<32x16xf32>
    %17 = arith.subf %16, %15 : vector<32x16xf32>
    %18 = math.exp %17 : vector<32x16xf32>
    %cst_13 = arith.constant 1.000000e+00 : f32
    %19 = vector.broadcast %cst_13 : f32 to vector<32x16xf32>
    %20 = arith.addf %19, %18 : vector<32x16xf32>
    %21 = math.log %20 : vector<32x16xf32>
    %22 = arith.addf %14, %21 : vector<32x16xf32>
    %c0_14 = arith.constant 0 : index
    %c0_15 = arith.constant 0 : index
    %23 = vector.load %arg6[%c0_14, %c0_15] : memref<16x32xf32, #tpu.memory_space<vmem>>, vector<16x32xf32>
    %cst_16 = arith.constant dense<0.000000e+00> : vector<32x32xf32>
    %24 = tpu.matmul %22, %23, %cst_16 {dimension_numbers = #tpu.dot_dimension_numbers<[1], [0], [0], [1], [0, 0, 1, 1], [], []>} : vector<32x16xf32>, vector<16x32xf32>, vector<32x32xf32> -> vector<32x32xf32>
    %c0_17 = arith.constant 0 : index
    %c0_18 = arith.constant 0 : index
    %25 = vector.load %arg7[%c0_17, %c0_18] : memref<1x32xf32, #tpu.memory_space<vmem>>, vector<1x32xf32>
    %26 = vector.broadcast %25 : vector<1x32xf32> to vector<32x32xf32>
    %27 = arith.addf %24, %26 : vector<32x32xf32>
    %cst_19 = arith.constant 0.000000e+00 : f32
    %28 = vector.broadcast %cst_19 : f32 to vector<32x32xf32>
    %29 = arith.maximumf %27, %28 : vector<32x32xf32>
    %30 = math.absf %27 : vector<32x32xf32>
    %cst_20 = arith.constant 0.000000e+00 : f32
    %31 = vector.broadcast %cst_20 : f32 to vector<32x32xf32>
    %32 = arith.subf %31, %30 : vector<32x32xf32>
    %33 = math.exp %32 : vector<32x32xf32>
    %cst_21 = arith.constant 1.000000e+00 : f32
    %34 = vector.broadcast %cst_21 : f32 to vector<32x32xf32>
    %35 = arith.addf %34, %33 : vector<32x32xf32>
    %36 = math.log %35 : vector<32x32xf32>
    %37 = arith.addf %29, %36 : vector<32x32xf32>
    %c0_22 = arith.constant 0 : index
    %c0_23 = arith.constant 0 : index
    %38 = vector.load %arg8[%c0_22, %c0_23] : memref<32x2xf32, #tpu.memory_space<vmem>>, vector<32x2xf32>
    %cst_24 = arith.constant dense<0.000000e+00> : vector<32x2xf32>
    %39 = tpu.matmul %37, %38, %cst_24 {dimension_numbers = #tpu.dot_dimension_numbers<[1], [0], [0], [1], [0, 0, 1, 1], [], []>} : vector<32x32xf32>, vector<32x2xf32>, vector<32x2xf32> -> vector<32x2xf32>
    %c0_25 = arith.constant 0 : index
    %c0_26 = arith.constant 0 : index
    %40 = vector.load %arg9[%c0_25, %c0_26] : memref<1x2xf32, #tpu.memory_space<vmem>>, vector<1x2xf32>
    %41 = vector.broadcast %40 : vector<1x2xf32> to vector<32x2xf32>
    %42 = arith.addf %39, %41 : vector<32x2xf32>
    %cst_27 = arith.constant 0.000000e+00 : f32
    %43 = vector.broadcast %cst_27 : f32 to vector<32x2xf32>
    %44 = arith.maximumf %42, %43 : vector<32x2xf32>
    %45 = math.absf %42 : vector<32x2xf32>
    %cst_28 = arith.constant 0.000000e+00 : f32
    %46 = vector.broadcast %cst_28 : f32 to vector<32x2xf32>
    %47 = arith.subf %46, %45 : vector<32x2xf32>
    %48 = math.exp %47 : vector<32x2xf32>
    %cst_29 = arith.constant 1.000000e+00 : f32
    %49 = vector.broadcast %cst_29 : f32 to vector<32x2xf32>
    %50 = arith.addf %49, %48 : vector<32x2xf32>
    %51 = math.log %50 : vector<32x2xf32>
    %52 = arith.addf %44, %51 : vector<32x2xf32>
    %c0_30 = arith.constant 0 : index
    %c0_31 = arith.constant 0 : index
    %53 = vector.load %arg10[%c0_30, %c0_31] : memref<2x1xf32, #tpu.memory_space<vmem>>, vector<2x1xf32>
    %cst_32 = arith.constant dense<0.000000e+00> : vector<32x1xf32>
    %54 = tpu.matmul %52, %53, %cst_32 {dimension_numbers = #tpu.dot_dimension_numbers<[1], [0], [0], [1], [0, 0, 1, 1], [], []>} : vector<32x2xf32>, vector<2x1xf32>, vector<32x1xf32> -> vector<32x1xf32>
    %c0_33 = arith.constant 0 : index
    %c0_34 = arith.constant 0 : index
    %55 = vector.load %arg11[%c0_33, %c0_34] : memref<1x1xf32, #tpu.memory_space<vmem>>, vector<1x1xf32>
    %56 = vector.broadcast %55 : vector<1x1xf32> to vector<32x1xf32>
    %57 = arith.addf %54, %56 : vector<32x1xf32>
    %c0_35 = arith.constant 0 : index
    %c0_36 = arith.constant 0 : index
    %58 = vector.load %arg12[%c0_35, %c0_36] : memref<32x1xf32, #tpu.memory_space<vmem>>, vector<32x1xf32>
    tpu.vector_store %arg12[%c0_35, %c0_36], %57 {strides = array<i32>} : memref<32x1xf32, #tpu.memory_space<vmem>>, vector<32x1xf32>,
    return
  }
  func.func @transform_0(%arg0: i32) -> (i32, i32) {
    %c0_i32 = arith.constant 0 : i32
    %c0_i32_0 = arith.constant 0 : i32
    %c0_i32_1 = arith.constant 0 : i32
    return %c0_i32, %c0_i32_0 : i32, i32
  }
  func.func @transform_1(%arg0: i32) -> (i32, i32) {
    %c0_i32 = arith.constant 0 : i32
    %c0_i32_0 = arith.constant 0 : i32
    %c0_i32_1 = arith.constant 0 : i32
    return %c0_i32, %c0_i32_0 : i32, i32
  }
  func.func @transform_2(%arg0: i32) -> (i32, i32) {
    %c0_i32 = arith.constant 0 : i32
    %c0_i32_0 = arith.constant 0 : i32
    %c0_i32_1 = arith.constant 0 : i32
    return %c0_i32, %c0_i32_0 : i32, i32
  }
  func.func @transform_3(%arg0: i32) -> (i32, i32) {
    %c0_i32 = arith.constant 0 : i32
    %c0_i32_0 = arith.constant 0 : i32
    %c0_i32_1 = arith.constant 0 : i32
    return %c0_i32, %c0_i32_0 : i32, i32
  }
  func.func @transform_4(%arg0: i32) -> (i32, i32) {
    %c0_i32 = arith.constant 0 : i32
    %c0_i32_0 = arith.constant 0 : i32
    %c0_i32_1 = arith.constant 0 : i32
    return %c0_i32, %c0_i32_0 : i32, i32
  }
  func.func @transform_5(%arg0: i32) -> (i32, i32) {
    %c0_i32 = arith.constant 0 : i32
    %c0_i32_0 = arith.constant 0 : i32
    %c0_i32_1 = arith.constant 0 : i32
    return %c0_i32, %c0_i32_0 : i32, i32
  }
  func.func @transform_6(%arg0: i32) -> (i32, i32) {
    %c0_i32 = arith.constant 0 : i32
    %c0_i32_0 = arith.constant 0 : i32
    %c0_i32_1 = arith.constant 0 : i32
    return %c0_i32, %c0_i32_0 : i32, i32
  }
  func.func @transform_7(%arg0: i32) -> (i32, i32) {
    %c0_i32 = arith.constant 0 : i32
    %c0_i32_0 = arith.constant 0 : i32
    %c0_i32_1 = arith.constant 0 : i32
    return %c0_i32, %c0_i32_0 : i32, i32
  }
  func.func @transform_8(%arg0: i32) -> (i32, i32) {
    %c0_i32 = arith.constant 0 : i32
    %c0_i32_0 = arith.constant 0 : i32
    %c0_i32_1 = arith.constant 0 : i32
    return %c0_i32, %c0_i32_0 : i32, i32
  }
  func.func @transform_9(%arg0: i32) -> (i32, i32) {
    %c0_i32 = arith.constant 0 : i32
    %c0_i32_0 = arith.constant 0 : i32
    %c0_i32_1 = arith.constant 0 : i32
    return %c0_i32, %c0_i32_0 : i32, i32
  }
  func.func @transform_10(%arg0: i32) -> (i32, i32) {
    %c0_i32 = arith.constant 0 : i32
    %c0_i32_0 = arith.constant 0 : i32
    %c0_i32_1 = arith.constant 0 : i32
    return %c0_i32, %c0_i32_0 : i32, i32
  }
  func.func @transform_11(%arg0: i32) -> (i32, i32) {
    %c0_i32 = arith.constant 0 : i32
    %c0_i32_0 = arith.constant 0 : i32
    %c0_i32_1 = arith.constant 0 : i32
    return %c0_i32, %c0_i32_0 : i32, i32
  }
}

module attributes {stable_mosaic.version = 11 : i64} {
  func.func @_finalize_kernel(%arg0: i32, %arg1: memref<1x4x4xf32, #tpu.memory_space<vmem>>, %arg2: memref<64x4xf32, #tpu.memory_space<vmem>>, %arg3: memref<4x64xf32, #tpu.memory_space<vmem>>, %arg4: memref<1x64x64xf32, #tpu.memory_space<vmem>>, %arg5: memref<1x1xf32, #tpu.memory_space<vmem>>, %arg6: memref<1x64x64xf32, #tpu.memory_space<vmem>>) attributes {dimension_semantics = [#tpu.dimension_semantics<parallel>], iteration_bounds = array<i64: 2>, scalar_prefetch = 0 : i64, scratch_operands = 0 : i64, tpu.core_type = #tpu.core_type<tc>, window_params = [{transform_indices = @transform_0, window_bounds = array<i64: 1, 4, 4>}, {pipeline_mode = #tpu.pipeline_mode<synchronous>, transform_indices = @transform_1, window_bounds = array<i64: 64, 4>}, {pipeline_mode = #tpu.pipeline_mode<synchronous>, transform_indices = @transform_2, window_bounds = array<i64: 4, 64>}, {transform_indices = @transform_3, window_bounds = array<i64: 1, 64, 64>}, {pipeline_mode = #tpu.pipeline_mode<synchronous>, transform_indices = @transform_4, window_bounds = array<i64: 1, 1>}, {transform_indices = @transform_5, window_bounds = array<i64: 1, 64, 64>}]} {
    %c0 = arith.constant 0 : index
    %c0_0 = arith.constant 0 : index
    %c0_1 = arith.constant 0 : index
    %0 = vector.load %arg1[%c0, %c0_0, %c0_1] : memref<1x4x4xf32, #tpu.memory_space<vmem>>, vector<1x4x4xf32>
    %1 = vector.shape_cast %0 : vector<1x4x4xf32> to vector<4x4xf32>
    %c0_2 = arith.constant 0 : index
    %c0_3 = arith.constant 0 : index
    %2 = vector.load %arg2[%c0_2, %c0_3] : memref<64x4xf32, #tpu.memory_space<vmem>>, vector<64x4xf32>
    %cst = arith.constant dense<0.000000e+00> : vector<64x4xf32>
    %3 = tpu.matmul %2, %1, %cst {dimension_numbers = #tpu.dot_dimension_numbers<[1], [0], [0], [1], [0, 0, 1, 1], [], []>} : vector<64x4xf32>, vector<4x4xf32>, vector<64x4xf32> -> vector<64x4xf32>
    %c0_4 = arith.constant 0 : index
    %c0_5 = arith.constant 0 : index
    %4 = vector.load %arg3[%c0_4, %c0_5] : memref<4x64xf32, #tpu.memory_space<vmem>>, vector<4x64xf32>
    %cst_6 = arith.constant dense<0.000000e+00> : vector<64x64xf32>
    %5 = tpu.matmul %3, %4, %cst_6 {dimension_numbers = #tpu.dot_dimension_numbers<[1], [0], [0], [1], [0, 0, 1, 1], [], []>} : vector<64x4xf32>, vector<4x64xf32>, vector<64x64xf32> -> vector<64x64xf32>
    %c0_7 = arith.constant 0 : index
    %c0_8 = arith.constant 0 : index
    %6 = vector.load %arg5[%c0_7, %c0_8] : memref<1x1xf32, #tpu.memory_space<vmem>>, vector<1x1xf32>
    %c0_9 = arith.constant 0 : index
    %c0_10 = arith.constant 0 : index
    %c0_11 = arith.constant 0 : index
    %7 = vector.load %arg4[%c0_9, %c0_10, %c0_11] : memref<1x64x64xf32, #tpu.memory_space<vmem>>, vector<1x64x64xf32>
    %8 = vector.shape_cast %7 : vector<1x64x64xf32> to vector<64x64xf32>
    %9 = vector.broadcast %6 : vector<1x1xf32> to vector<64x64xf32>
    %10 = arith.mulf %9, %8 : vector<64x64xf32>
    %11 = arith.addf %5, %10 : vector<64x64xf32>
    %12 = vector.shape_cast %11 : vector<64x64xf32> to vector<1x64x64xf32>
    %cst_12 = arith.constant dense<0xFF800000> : vector<1xf32>
    %13 = vector.multi_reduction <maximumf>, %12, %cst_12 [1, 2] : vector<1x64x64xf32> to vector<1xf32>
    %14 = vector.shape_cast %13 : vector<1xf32> to vector<1x1x1xf32>
    %15 = vector.extract %14[0, 0, 0] : f32 from vector<1x1x1xf32>
    %16 = vector.broadcast %15 : f32 to vector<64x64xf32>
    %17 = arith.subf %11, %16 : vector<64x64xf32>
    %18 = math.exp %17 : vector<64x64xf32>
    %19 = vector.shape_cast %18 : vector<64x64xf32> to vector<1x64x64xf32>
    %cst_13 = arith.constant dense<0.000000e+00> : vector<1xf32>
    %20 = vector.multi_reduction <add>, %19, %cst_13 [1, 2] : vector<1x64x64xf32> to vector<1xf32>
    %21 = vector.shape_cast %20 : vector<1xf32> to vector<1x1x1xf32>
    %22 = vector.extract %21[0, 0, 0] : f32 from vector<1x1x1xf32>
    %23 = math.log %22 : f32
    %24 = arith.addf %15, %23 : f32
    %cst_14 = arith.constant 1.38629436 : f32
    %25 = arith.addf %24, %cst_14 : f32
    %26 = vector.broadcast %25 : f32 to vector<64x64xf32>
    %27 = arith.subf %11, %26 : vector<64x64xf32>
    %c0_15 = arith.constant 0 : index
    %c0_16 = arith.constant 0 : index
    %c0_17 = arith.constant 0 : index
    %28 = vector.load %arg6[%c0_15, %c0_16, %c0_17] : memref<1x64x64xf32, #tpu.memory_space<vmem>>, vector<1x64x64xf32>
    %29 = vector.shape_cast %28 : vector<1x64x64xf32> to vector<64x64xf32>
    %30 = vector.shape_cast %27 : vector<64x64xf32> to vector<1x64x64xf32>
    tpu.vector_store %arg6[%c0_15, %c0_16, %c0_17], %30 {strides = array<i32>} : memref<1x64x64xf32, #tpu.memory_space<vmem>>, vector<1x64x64xf32>,
    return
  }
  func.func @transform_0(%arg0: i32) -> (i32, i32, i32) {
    %c0_i32 = arith.constant 0 : i32
    %c0_i32_0 = arith.constant 0 : i32
    %c0_i32_1 = arith.constant 0 : i32
    return %arg0, %c0_i32, %c0_i32_0 : i32, i32, i32
  }
  func.func @transform_1(%arg0: i32) -> (i32, i32) {
    %c0_i32 = arith.constant 0 : i32
    %c0_i32_0 = arith.constant 0 : i32
    %c0_i32_1 = arith.constant 0 : i32
    return %c0_i32, %c0_i32_0 : i32, i32
  }
  func.func @transform_2(%arg0: i32) -> (i32, i32) {
    %c0_i32 = arith.constant 0 : i32
    %c0_i32_0 = arith.constant 0 : i32
    %c0_i32_1 = arith.constant 0 : i32
    return %c0_i32, %c0_i32_0 : i32, i32
  }
  func.func @transform_3(%arg0: i32) -> (i32, i32, i32) {
    %c0_i32 = arith.constant 0 : i32
    %c0_i32_0 = arith.constant 0 : i32
    %c0_i32_1 = arith.constant 0 : i32
    return %arg0, %c0_i32, %c0_i32_0 : i32, i32, i32
  }
  func.func @transform_4(%arg0: i32) -> (i32, i32) {
    %c0_i32 = arith.constant 0 : i32
    %c0_i32_0 = arith.constant 0 : i32
    %c0_i32_1 = arith.constant 0 : i32
    return %c0_i32, %c0_i32_0 : i32, i32
  }
  func.func @transform_5(%arg0: i32) -> (i32, i32, i32) {
    %c0_i32 = arith.constant 0 : i32
    %c0_i32_0 = arith.constant 0 : i32
    %c0_i32_1 = arith.constant 0 : i32
    return %arg0, %c0_i32, %c0_i32_0 : i32, i32, i32
  }
}

</mosaic_0001>

<bundles_post_ra>
// kernel: _lambda_.2
= control target key start
LH: loop header
LB: loop body
LE: loop exit
PB: predicated region body
PF: predicated region fallthrough
CT: control target
= control target key end

     0   :  { %vm62_vm0 = vcmask 1042432   ;;  %vm49_vm1 = vcmask 23552   ;;  %vm105_vm2 = vcmask 130048   ;;  %vm274_vm3 = vcmask 261120   ;;  %s643_s1 = inlined_call_operand.vmem [shape: f32[3,16], index: 1, kind: input, shape index: {}]   ;;  %s644_s0 = inlined_call_operand.vmem [shape: f32[32,3], index: 0, kind: input, shape index: {}]   ;;  %s645_s3 = inlined_call_operand.vmem [shape: f32[16,16], index: 3, kind: input, shape index: {}]   ;;  %s646_s2 = inlined_call_operand.vmem [shape: f32[1,16], index: 2, kind: input, shape index: {}]   ;;  %s647_s4 = inlined_call_operand.vmem [shape: f32[1,16], index: 4, kind: input, shape index: {}]   ;;  %s648_s6 = inlined_call_operand.vmem [shape: f32[1,32], index: 6, kind: input, shape index: {}]   ;;  %s649_s5 = inlined_call_operand.vmem [shape: f32[16,32], index: 5, kind: input, shape index: {}]   ;;  %s650_s8 = inlined_call_operand.vmem [shape: f32[1,2], index: 8, kind: input, shape index: {}]   ;;  %s651_s7 = inlined_call_operand.vmem [shape: f32[32,2], index: 7, kind: input, shape index: {}]   ;;  %s652_s9 = inlined_call_operand.vmem [shape: f32[2,1], index: 9, kind: input, shape index: {}]   ;;  %s653_s10 = inlined_call_operand.<no memory space> [shape: f32[1,1], index: 10, kind: input, shape index: {}]   ;;  %s654_s11 = inlined_call_operand.vmem [shape: f32[32,1], index: 11, kind: output, shape index: {}]  }
   0x1   :  { %v44_v0 = vld [vmem:[%s643_s1] sm:$0x7]  ;;  %v41_v2 = vld [vmem:[%s644_s0 + $0x8] sm:$0xff]  ;;  %v42_v3 = vld [vmem:[%s644_s0 + $0x10] sm:$0xff]  ;;  %vm370_vm4 = vcmask 1041408   ;;  %vm357_vm5 = vcmask 15360  }
   0x2   :  { %v40_v1 = vld [vmem:[%s644_s0] sm:$0xff]  ;;  %412 = vmatpush.msk.msra.mxu0 %vm62_vm0, %v44_v0  ;;  %434 = vmatpush.msk.msra.mxu1 %vm62_vm0, %v44_v0  ;;  %v43_v4 = vld [vmem:[%s644_s0 + $0x18] sm:$0xff]  ;;  %v100_v5 = vld [vmem:[%s645_s3 + $0x8] sm:$0xff]  ;;  %vm403_vm6 = vcmask 7168  }
   0x3   :  { %413 = vmatmul.msk.f32.vlgmr.msra.gmra.mxu0 %vm49_vm1, %v40_v1  ;;  %414 = vmatmul.msk.f32.vlgmr.msra.gmra.mxu1 %vm49_vm1, %v41_v2  ;;  %v99_v6 = vld [vmem:[%s645_s3] sm:$0xff]  ;;  %v184_v20 = vld [vmem:[%s649_s5 + $0x8] sm:$0xff] }
   0x4   :  { %435 = vmatpush.msk.msra.mxu2 %vm62_vm0, %v44_v0  ;;  %436 = vmatpush.msk.msra.mxu3 %vm62_vm0, %v44_v0  ;;  %v437_v7 = vld [vmem:[%s646_s2] ss:$0 sm:$0xff] }
   0x5   :  { %415 = vmatmul.msk.f32.vlgmr.msra.gmra.mxu2 %vm49_vm1, %v42_v3  ;;  %416 = vmatmul.msk.f32.vlgmr.msra.gmra.mxu3 %vm49_vm1, %v43_v4  ;;  %v183_v21 = vld [vmem:[%s649_s5] sm:$0xff]  ;;  %v269_v3 = vld [vmem:[%s651_s7 + $0x18] sm:$0xff]  ;;  %v268_v4 = vld [vmem:[%s651_s7 + $0x10] sm:$0xff] }
   0x6   :  { %132 = vmatpush.msrb.mxu1 %v100_v5  ;;  %215 = vmatpush.msrb.mxu2 %v184_v20  ;;  %v438_v22 = vld [vmem:[%s647_s4] ss:$0 sm:$0xff]  ;;  %v267_v5 = vld [vmem:[%s651_s7 + $0x8] sm:$0xff] }
   0x7   :  { %299 = vmatpush.msrb.mxu3 %v269_v3 }
   0x8   :  { %133 = vmatpush.msrb.mxu1 %v99_v6  ;;  %216 = vmatpush.msrb.mxu2 %v183_v21  ;;  %v266_v6 = vld [vmem:[%s651_s7] sm:$0xff] }
   0x9   :  { %300 = vmatpush.msrb.mxu3 %v268_v4 }
   0xb   :  { %301 = vmatpush.msrb.mxu3 %v267_v5 }
   0xd   :  { %302 = vmatpush.msrb.mxu3 %v266_v6  ;;  %v16_v6 = vstv %s653_s10 }
   0xe   :  { %17 = vst [vmem:[#allocation2] sm:$0x1] %v16_v6 }
  0x80   :  { %v83_v8 = vpop.f32.mrf.mxu0  ;;  %v86_v10 = vpop.f32.mrf.mxu1 }
  0x81   :  { %v84_v9 = vadd.f32 %v437_v7, %v83_v8  ;;  %v87_v12 = vadd.f32 %v437_v7, %v86_v10 }
  0x83   :  { %v95_v11 = vmax.f32 %v84_v9, 0.0  ;;  %v96_v13 = vmax.f32 %v87_v12, 0.0 }
  0x85   :  { %417 = vmatmul.msk.f32.vlgmr.msrb.gmra.mxu1 %vm105_vm2, %v95_v11 }
  0x88   :  { %v89_v14 = vpop.f32.mrf.mxu2  ;;  %v92_v17 = vpop.f32.mrf.mxu3 }
  0x89   :  { %v90_v15 = vadd.f32 %v437_v7, %v89_v14  ;;  %v93_v18 = vadd.f32 %v437_v7, %v92_v17  ;;  %v439_v7 = vld [vmem:[%s648_s6] ss:$0 sm:$0xff] }
  0x8b   :  { %v97_v16 = vmax.f32 %v90_v15, 0.0  ;;  %v98_v19 = vmax.f32 %v93_v18, 0.0 }
  0x8d   :  { %418 = vmatmul.msk.f32.gmra.mxu1 %vm105_vm2, %v96_v13 }
  0x95   :  { %419 = vmatmul.msk.f32.gmra.mxu1 %vm105_vm2, %v97_v16 }
  0x9d   :  { %420 = vmatmul.msk.f32.gmra.mxu1 %vm105_vm2, %v98_v19 }
 0x102   :  { %v135_v23 = vpop.f32.mrf.mxu1 }
 0x103   :  { %v136_v24 = vadd.f32 %v438_v22, %v135_v23 }
 0x105   :  { %v151_v25 = vand.u32 2147483647, %v136_v24  ;;  %v147_v44 = vmax.f32 %v136_v24, 0.0 }
 0x107   :  { %v155_v26 = vsub.f32 0.0, %v151_v25 }
 0x109   :  { %v159_v27 = vmul.f32 1.442695, %v155_v26 }
 0x10a   :  { %v138_v28 = vpop.f32.mrf.mxu1 }
 0x10b   :  { %442 = vpow2.f32 %v159_v27  ;;  %v139_v29 = vadd.f32 %v438_v22, %v138_v28 }
 0x10d   :  { %v152_v30 = vand.u32 2147483647, %v139_v29  ;;  %v148_v54 = vmax.f32 %v139_v29, 0.0 }
 0x10f   :  { %v156_v31 = vsub.f32 0.0, %v152_v30 }
 0x111   :  { %v443_v32 = vpop.eup %442  ;;  %v161_v33 = vmul.f32 1.442695, %v156_v31 }
 0x112   :  { %v167_v34 = vadd.f32 1.0, %v443_v32  ;;  %v141_v35 = vpop.f32.mrf.mxu1 }
 0x113   :  { %444 = vpow2.f32 %v161_v33  ;;  %v142_v36 = vadd.f32 %v438_v22, %v141_v35 }
 0x114   :  { %446 = vlog2.f32 %v167_v34 }
 0x115   :  { %v153_v37 = vand.u32 2147483647, %v142_v36  ;;  %v149_v60 = vmax.f32 %v142_v36, 0.0 }
 0x117   :  { %v157_v38 = vsub.f32 0.0, %v153_v37 }
 0x119   :  { %v445_v39 = vpop.eup %444  ;;  %v163_v40 = vmul.f32 1.442695, %v157_v38 }
 0x11a   :  { %v447_v41 = vpop.eup %446  ;;  %v168_v42 = vadd.f32 1.0, %v445_v39  ;;  %v144_v43 = vpop.f32.mrf.mxu1 }
 0x11b   :  { %v172_v45 = vmul.f32 0.6931472, %v447_v41  ;;  %448 = vpow2.f32 %v163_v40  ;;  %v145_v46 = vadd.f32 %v438_v22, %v144_v43 }
 0x11c   :  { %450 = vlog2.f32 %v168_v42 }
 0x11d   :  { %v179_v47 = vadd.f32 %v172_v45, %v147_v44  ;;  %v154_v48 = vand.u32 2147483647, %v145_v46  ;;  %v150_v0 = vmax.f32 %v145_v46, 0.0 }
 0x11f   :  { %v158_v49 = vsub.f32 0.0, %v154_v48  ;;  %421 = vmatmul.msk.f32.vlgmr.msrb.gmra.mxu2 %vm105_vm2, %v179_v47 }
 0x121   :  { %v449_v50 = vpop.eup %448  ;;  %v165_v51 = vmul.f32 1.442695, %v158_v49 }
 0x122   :  { %v451_v52 = vpop.eup %450  ;;  %v169_v53 = vadd.f32 1.0, %v449_v50 }
 0x123   :  { %452 = vpow2.f32 %v165_v51  ;;  %v174_v55 = vmul.f32 0.6931472, %v451_v52  ;;  %v352_v52 = vld [vmem:[%s652_s9] sm:$0x3] }
 0x124   :  { %454 = vlog2.f32 %v169_v53  ;;  %429 = vmatpush.msk.msrb.mxu0 %vm370_vm4, %v352_v52  ;;  %v440_v53 = vld [vmem:[%s650_s8] ss:$0 sm:$0xff] }
 0x125   :  { %v180_v56 = vadd.f32 %v174_v55, %v148_v54 }
 0x127   :  { %422 = vmatmul.msk.f32.gmra.mxu2 %vm105_vm2, %v180_v56 }
 0x129   :  { %v453_v57 = vpop.eup %452 }
 0x12a   :  { %v455_v58 = vpop.eup %454  ;;  %v170_v59 = vadd.f32 1.0, %v453_v57 }
 0x12b   :  { %v176_v61 = vmul.f32 0.6931472, %v455_v58 }
 0x12c   :  { %456 = vlog2.f32 %v170_v59 }
 0x12d   :  { %v181_v62 = vadd.f32 %v176_v61, %v149_v60 }
 0x12f   :  { %423 = vmatmul.msk.f32.gmra.mxu2 %vm105_vm2, %v181_v62 }
 0x132   :  { %v457_v63 = vpop.eup %456 }
 0x133   :  { %v178_v1 = vmul.f32 0.6931472, %v457_v63 }
 0x135   :  { %v182_v2 = vadd.f32 %v178_v1, %v150_v0 }
 0x137   :  { %424 = vmatmul.msk.f32.gmra.mxu2 %vm105_vm2, %v182_v2 }
 0x1a2   :  { %v218_v8 = vpop.f32.mrf.mxu2 }
 0x1a3   :  { %v219_v9 = vadd.f32 %v439_v7, %v218_v8 }
 0x1a5   :  { %v234_v10 = vand.u32 2147483647, %v219_v9  ;;  %v230_v29 = vmax.f32 %v219_v9, 0.0 }
 0x1a7   :  { %v238_v11 = vsub.f32 0.0, %v234_v10 }
 0x1a9   :  { %v242_v12 = vmul.f32 1.442695, %v238_v11 }
 0x1aa   :  { %v221_v13 = vpop.f32.mrf.mxu2 }
 0x1ab   :  { %458 = vpow2.f32 %v242_v12  ;;  %v222_v14 = vadd.f32 %v439_v7, %v221_v13 }
 0x1ad   :  { %v235_v15 = vand.u32 2147483647, %v222_v14  ;;  %v231_v39 = vmax.f32 %v222_v14, 0.0 }
 0x1af   :  { %v239_v16 = vsub.f32 0.0, %v235_v15 }
 0x1b1   :  { %v459_v17 = vpop.eup %458  ;;  %v244_v18 = vmul.f32 1.442695, %v239_v16 }
 0x1b2   :  { %v250_v19 = vadd.f32 1.0, %v459_v17  ;;  %v224_v20 = vpop.f32.mrf.mxu2 }
 0x1b3   :  { %460 = vpow2.f32 %v244_v18  ;;  %v225_v21 = vadd.f32 %v439_v7, %v224_v20 }
 0x1b4   :  { %462 = vlog2.f32 %v250_v19 }
 0x1b5   :  { %v236_v22 = vand.u32 2147483647, %v225_v21  ;;  %v232_v45 = vmax.f32 %v225_v21, 0.0 }
 0x1b7   :  { %v240_v23 = vsub.f32 0.0, %v236_v22 }
 0x1b9   :  { %v461_v24 = vpop.eup %460  ;;  %v246_v25 = vmul.f32 1.442695, %v240_v23 }
 0x1ba   :  { %v463_v26 = vpop.eup %462  ;;  %v251_v27 = vadd.f32 1.0, %v461_v24  ;;  %v227_v28 = vpop.f32.mrf.mxu2 }
 0x1bb   :  { %v255_v30 = vmul.f32 0.6931472, %v463_v26  ;;  %464 = vpow2.f32 %v246_v25  ;;  %v228_v31 = vadd.f32 %v439_v7, %v227_v28 }
 0x1bc   :  { %466 = vlog2.f32 %v251_v27 }
 0x1bd   :  { %v262_v32 = vadd.f32 %v255_v30, %v230_v29  ;;  %v237_v33 = vand.u32 2147483647, %v228_v31  ;;  %v233_v49 = vmax.f32 %v228_v31, 0.0 }
 0x1bf   :  { %v241_v34 = vsub.f32 0.0, %v237_v33  ;;  %425 = vmatmul.msk.f32.vlgmr.msrb.gmra.mxu3 %vm274_vm3, %v262_v32 }
 0x1c1   :  { %v465_v35 = vpop.eup %464  ;;  %v248_v36 = vmul.f32 1.442695, %v241_v34 }
 0x1c2   :  { %v467_v37 = vpop.eup %466  ;;  %v252_v38 = vadd.f32 1.0, %v465_v35  ;;  %v441_v35 = vld [vmem:[#allocation2] ss:$0 sm:$0xff] }
 0x1c3   :  { %468 = vpow2.f32 %v248_v36  ;;  %v257_v40 = vmul.f32 0.6931472, %v467_v37 }
 0x1c4   :  { %470 = vlog2.f32 %v252_v38 }
 0x1c5   :  { %v263_v41 = vadd.f32 %v257_v40, %v231_v39 }
 0x1c7   :  { %426 = vmatmul.msk.f32.gmra.mxu3 %vm274_vm3, %v263_v41 }
 0x1c9   :  { %v469_v42 = vpop.eup %468 }
 0x1ca   :  { %v471_v43 = vpop.eup %470  ;;  %v253_v44 = vadd.f32 1.0, %v469_v42 }
 0x1cb   :  { %v259_v46 = vmul.f32 0.6931472, %v471_v43 }
 0x1cc   :  { %472 = vlog2.f32 %v253_v44 }
 0x1cd   :  { %v264_v47 = vadd.f32 %v259_v46, %v232_v45 }
 0x1cf   :  { %427 = vmatmul.msk.f32.gmra.mxu3 %vm274_vm3, %v264_v47 }
 0x1d2   :  { %v473_v48 = vpop.eup %472 }
 0x1d3   :  { %v261_v50 = vmul.f32 0.6931472, %v473_v48 }
 0x1d5   :  { %v265_v51 = vadd.f32 %v261_v50, %v233_v49 }
 0x1d7   :  { %428 = vmatmul.msk.f32.gmra.mxu3 %vm274_vm3, %v265_v51 }
 0x242   :  { %v304_v54 = vpop.f32.mrf.mxu3 }
 0x243   :  { %v305_v55 = vadd.f32 %v440_v53, %v304_v54 }
 0x245   :  { %v320_v56 = vand.u32 2147483647, %v305_v55  ;;  %v316_v12 = vmax.f32 %v305_v55, 0.0 }
 0x247   :  { %v324_v57 = vsub.f32 0.0, %v320_v56 }
 0x249   :  { %v328_v58 = vmul.f32 1.442695, %v324_v57 }
 0x24a   :  { %v307_v59 = vpop.f32.mrf.mxu3 }
 0x24b   :  { %474 = vpow2.f32 %v328_v58  ;;  %v308_v60 = vadd.f32 %v440_v53, %v307_v59 }
 0x24d   :  { %v321_v61 = vand.u32 2147483647, %v308_v60  ;;  %v317_v22 = vmax.f32 %v308_v60, 0.0 }
 0x24f   :  { %v325_v62 = vsub.f32 0.0, %v321_v61 }
 0x251   :  { %v475_v63 = vpop.eup %474  ;;  %v330_v0 = vmul.f32 1.442695, %v325_v62 }
 0x252   :  { %v336_v1 = vadd.f32 1.0, %v475_v63  ;;  %v310_v2 = vpop.f32.mrf.mxu3 }
 0x253   :  { %476 = vpow2.f32 %v330_v0  ;;  %v311_v3 = vadd.f32 %v440_v53, %v310_v2 }
 0x254   :  { %478 = vlog2.f32 %v336_v1 }
 0x255   :  { %v322_v4 = vand.u32 2147483647, %v311_v3  ;;  %v318_v28 = vmax.f32 %v311_v3, 0.0 }
 0x257   :  { %v326_v5 = vsub.f32 0.0, %v322_v4 }
 0x259   :  { %v477_v7 = vpop.eup %476  ;;  %v332_v8 = vmul.f32 1.442695, %v326_v5 }
 0x25a   :  { %v479_v9 = vpop.eup %478  ;;  %v337_v10 = vadd.f32 1.0, %v477_v7  ;;  %v313_v11 = vpop.f32.mrf.mxu3 }
 0x25b   :  { %v341_v13 = vmul.f32 0.6931472, %v479_v9  ;;  %480 = vpow2.f32 %v332_v8  ;;  %v314_v14 = vadd.f32 %v440_v53, %v313_v11 }
 0x25c   :  { %482 = vlog2.f32 %v337_v10 }
 0x25d   :  { %v348_v15 = vadd.f32 %v341_v13, %v316_v12  ;;  %v323_v16 = vand.u32 2147483647, %v314_v14  ;;  %v319_v32 = vmax.f32 %v314_v14, 0.0 }
 0x25f   :  { %v327_v17 = vsub.f32 0.0, %v323_v16  ;;  %430 = vmatmul.msk.f32.vlgmr.msrb.gmra.mxu0 %vm357_vm5, %v348_v15 }
 0x261   :  { %v481_v18 = vpop.eup %480  ;;  %v334_v19 = vmul.f32 1.442695, %v327_v17 }
 0x262   :  { %v483_v20 = vpop.eup %482  ;;  %v338_v21 = vadd.f32 1.0, %v481_v18 }
 0x263   :  { %484 = vpow2.f32 %v334_v19  ;;  %v343_v23 = vmul.f32 0.6931472, %v483_v20 }
 0x264   :  { %486 = vlog2.f32 %v338_v21 }
 0x265   :  { %v349_v24 = vadd.f32 %v343_v23, %v317_v22 }
 0x267   :  { %431 = vmatmul.msk.f32.gmra.mxu0 %vm357_vm5, %v349_v24 }
 0x269   :  { %v485_v25 = vpop.eup %484 }
 0x26a   :  { %v487_v26 = vpop.eup %486  ;;  %v339_v27 = vadd.f32 1.0, %v485_v25 }
 0x26b   :  { %v345_v29 = vmul.f32 0.6931472, %v487_v26 }
 0x26c   :  { %488 = vlog2.f32 %v339_v27 }
 0x26d   :  { %v350_v30 = vadd.f32 %v345_v29, %v318_v28 }
 0x26f   :  { %432 = vmatmul.msk.f32.gmra.mxu0 %vm357_vm5, %v350_v30 }
 0x272   :  { %v489_v31 = vpop.eup %488 }
 0x273   :  { %v347_v33 = vmul.f32 0.6931472, %v489_v31 }
 0x275   :  { %v351_v34 = vadd.f32 %v347_v33, %v319_v32 }
 0x277   :  { %433 = vmatmul.msk.f32.gmra.mxu0 %vm357_vm5, %v351_v34 }
 0x2dc   :  { %v391_v36 = vpop.f32.mrf.mxu0 }
 0x2dd   :  { %v392_v37 = vadd.f32 %v441_v35, %v391_v36 }
 0x2df   :  { %404 = vst.msk [vmem:[%s654_s11] sm:$0xff] %vm403_vm6, %v392_v37 }
 0x2e4   :  { %v394_v38 = vpop.f32.mrf.mxu0 }
 0x2e5   :  { %v395_v39 = vadd.f32 %v441_v35, %v394_v38 }
 0x2e7   :  { %405 = vst.msk [vmem:[%s654_s11 + $0x8] sm:$0xff] %vm403_vm6, %v395_v39 }
 0x2ec   :  { %v397_v40 = vpop.f32.mrf.mxu0 }
 0x2ed   :  { %v398_v41 = vadd.f32 %v441_v35, %v397_v40 }
 0x2ef   :  { %406 = vst.msk [vmem:[%s654_s11 + $0x10] sm:$0xff] %vm403_vm6, %v398_v41 }
 0x2f4   :  { %v400_v42 = vpop.f32.mrf.mxu0 }
 0x2f5   :  { %v401_v43 = vadd.f32 %v441_v35, %v400_v42 }
 0x2f7   :  { %407 = vst.msk [vmem:[%s654_s11 + $0x18] sm:$0xff] %vm403_vm6, %v401_v43 }

// kernel: _lambda_.3
= control target key start
LH: loop header
LB: loop body
LE: loop exit
PB: predicated region body
PF: predicated region fallthrough
CT: control target
= control target key end

     0   :  { %s690_s20 = smov 0   ;;  %s833_s0 = inlined_call_operand.vmem [shape: f32[2,4,4], index: 0, kind: input, shape index: {}]   ;;  %s834_s1 = inlined_call_operand.vmem [shape: f32[64,4], index: 1, kind: input, shape index: {}]   ;;  %s835_s2 = inlined_call_operand.vmem [shape: f32[4,64], index: 2, kind: input, shape index: {}]   ;;  %s836_s3 = inlined_call_operand.vmem [shape: f32[2,64,64], index: 3, kind: input, shape index: {}]   ;;  %s837_s4 = inlined_call_operand.<no memory space> [shape: f32[1,1], index: 4, kind: input, shape index: {}]   ;;  %s838_s5 = inlined_call_operand.vmem [shape: f32[2,64,64], index: 5, kind: output, shape index: {}]  }
   0x1   :  { %v10_v0 = vstv %s837_s4 }
   0x2   :  { %11 = vst [vmem:[#allocation2] sm:$0x1] %v10_v0 }
   0x3 LB: > { %s579_s21 = sadd.s32 4294967295, %s654_s20   ;;  %p583_p0 = scmp.ge.s32.totalorder %s654_s20, 1  ;;  %s654_s20 = sphi %s690_s20, %s17_s20  }
   0x4   : > { %p198_p1 = scmp.lt.s32.totalorder %s654_s20, 3 }
   0x6   : > { %p199_p2 = pnand %p583_p0, %p198_p1 }
   0x7   : > { %p230_p3 = scmp.lt.s32.totalorder (!%p199_p2), %s579_s21, 1 }
   0x8   : > { %202 = sbr.rel (%p199_p2) target bundleno = 774 (0x306), region = 40 }
   0xd   : > { %s840_s21 = smov (!%p230_p3, %s579_s21), 1  ;;  %vm278_vm0 = vcmask 1043456   ;;  %v249_v1 = vld [vmem:[%s834_s1 + $0x20] sm:$0xff]  ;;  %vm253_vm1 = vcmask 31744   ;;  %v250_v4 = vld [vmem:[%s834_s1 + $0x28] sm:$0xff]  ;;  %v251_v6 = vld [vmem:[%s834_s1 + $0x30] sm:$0xff] }
   0xe   : > { %s584_s4 = sshll.u32 %s840_s21, 2  ;;  %v245_v2 = vld [vmem:[%s834_s1] sm:$0xff]  ;;  %v246_v5 = vld [vmem:[%s834_s1 + $0x8] sm:$0xff]  ;;  %v247_v7 = vld [vmem:[%s834_s1 + $0x10] sm:$0xff]  ;;  %v656_v12 = vmov 0   ;;  %s609_s18 = sshll.u32 %s840_s21, 6 }
   0xf   : > { %s233_s24 = scalar_lea.vmem %s833_s0, %s584_s4  ;;  %v252_v8 = vld [vmem:[%s834_s1 + $0x38] sm:$0xff]  ;;  %v323_v10 = vld [vmem:[%s835_s2] sm:$0xf]  ;;  %628 = vset.pattern.permute.xlu0 %v656_v12  ;;  %s238_s22 = scalar_lea.vmem %s836_s3, %s609_s18  ;;  %vm415_vm2 = vcmask 523264  }
  0x10   : > { %v244_v3 = vld [vmem:[%s233_s24] sm:$0xf]  ;;  %v248_v9 = vld [vmem:[%s834_s1 + $0x18] sm:$0xff]  ;;  %612 = vmatpush.msk.msra.mxu3 %vm278_vm0, %v323_v10  ;;  %598 = vmatpush.msk.msra.mxu1 %vm278_vm0, %v323_v10  ;;  %v326_v26 = vld [vmem:[%s238_s22 + $0x8] sm:$0xff]  ;;  %s243_s30 = scalar_lea.vmem %s838_s5, %s609_s18 }
  0x11   : > { %611 = vmatpush.msk.msra.mxu2 %vm278_vm0, %v244_v3  ;;  %589 = vmatpush.msk.msra.mxu0 %vm278_vm0, %v244_v3  ;;  %v629_v11 = vld [vmem:[#allocation2] ss:$0 sm:$0xff]  ;;  %v330_v27 = vld [vmem:[%s238_s22 + $0x28] sm:$0xff]  ;;  %v327_v31 = vld [vmem:[%s238_s22 + $0x10] sm:$0xff] }
  0x12   : > { %594 = vmatmul.msk.f32.vlgmr.msra.gmra.mxu2 %vm253_vm1, %v249_v1  ;;  %590 = vmatmul.msk.f32.vlgmr.msra.gmra.mxu0 %vm253_vm1, %v245_v2  ;;  %v325_v29 = vld [vmem:[%s238_s22] sm:$0xff]  ;;  %v331_v32 = vld [vmem:[%s238_s22 + $0x30] sm:$0xff]  ;;  %v328_v33 = vld [vmem:[%s238_s22 + $0x18] sm:$0xff] }
  0x13   : > { %336 = vperm.xlu0 %628, %v629_v11   ;;  %v329_v30 = vld [vmem:[%s238_s22 + $0x20] sm:$0xff]  ;;  %v332_v43 = vld [vmem:[%s238_s22 + $0x38] sm:$0xff] }
  0x1a   : > { %595 = vmatmul.msk.f32.gmra.mxu2 %vm253_vm1, %v250_v4  ;;  %591 = vmatmul.msk.f32.gmra.mxu0 %vm253_vm1, %v246_v5 }
  0x22   : > { %596 = vmatmul.msk.f32.gmra.mxu2 %vm253_vm1, %v251_v6  ;;  %592 = vmatmul.msk.f32.gmra.mxu0 %vm253_vm1, %v247_v7 }
  0x2a   : > { %597 = vmatmul.msk.f32.gmra.mxu2 %vm253_vm1, %v252_v8  ;;  %593 = vmatmul.msk.f32.gmra.mxu0 %vm253_vm1, %v248_v9 }
  0x85   : > { %v337_v28 = vpop.permute.xlu0 %336 }
  0x86   : > { %v340_v34 = vmul.f32 %v337_v28, %v326_v26  ;;  %v344_v35 = vmul.f32 %v337_v28, %v330_v27  ;;  %v339_v36 = vmul.f32 %v337_v28, %v325_v29  ;;  %v343_v37 = vmul.f32 %v337_v28, %v329_v30 }
  0x87   : > { %v341_v39 = vmul.f32 %v337_v28, %v327_v31  ;;  %v345_v40 = vmul.f32 %v337_v28, %v331_v32  ;;  %v342_v41 = vmul.f32 %v337_v28, %v328_v33  ;;  %v346_v51 = vmul.f32 %v337_v28, %v332_v43 }
  0x8f   : > { %v299_v13 = vpop.f32.mrf.mxu0 }
  0x90   : > { %599 = vmatmul.msk.f32.vlgmr.msra.gmra.mxu1 %vm253_vm1, %v299_v13 }
  0x95   : > { %v311_v14 = vpop.f32.mrf.mxu2 }
  0x96   : > { %603 = vmatmul.msk.f32.vlgmr.msra.gmra.mxu3 %vm253_vm1, %v311_v14 }
  0x97   : > { %v302_v15 = vpop.f32.mrf.mxu0 }
  0x98   : > { %600 = vmatmul.msk.f32.gmra.mxu1 %vm253_vm1, %v302_v15 }
  0x9d   : > { %v314_v16 = vpop.f32.mrf.mxu2 }
  0x9e   : > { %604 = vmatmul.msk.f32.gmra.mxu3 %vm253_vm1, %v314_v16 }
  0x9f   : > { %v305_v17 = vpop.f32.mrf.mxu0 }
  0xa0   : > { %601 = vmatmul.msk.f32.gmra.mxu1 %vm253_vm1, %v305_v17 }
  0xa5   : > { %v317_v18 = vpop.f32.mrf.mxu2 }
  0xa6   : > { %605 = vmatmul.msk.f32.gmra.mxu3 %vm253_vm1, %v317_v18 }
  0xa7   : > { %v308_v19 = vpop.f32.mrf.mxu0 }
  0xa8   : > { %602 = vmatmul.msk.f32.gmra.mxu1 %vm253_vm1, %v308_v19 }
  0xad   : > { %v320_v20 = vpop.f32.mrf.mxu2 }
  0xae   : > { %606 = vmatmul.msk.f32.gmra.mxu3 %vm253_vm1, %v320_v20 }
 0x10d   : > { %v391_v21 = vpop.f32.mrf.mxu1 }
 0x10e   : > { %v761_v46 = vadd.f32 %v391_v21, %v339_v36 }
 0x110   : > { %v416_v54 = vsel %vm415_vm2, %v761_v46, -inf }
 0x115   : > { %v394_v22 = vpop.f32.mrf.mxu1 }
 0x116   : > { %v757_v44 = vadd.f32 %v394_v22, %v340_v34 }
 0x118   : > { %v417_v52 = vsel %vm415_vm2, %v757_v44, -inf }
 0x119   : > { %v403_v23 = vpop.f32.mrf.mxu3 }
 0x11a   : > { %v763_v47 = vadd.f32 %v403_v23, %v343_v37 }
 0x11c   : > { %v420_v55 = vsel %vm415_vm2, %v763_v47, -inf }
 0x11d   : > { %v397_v25 = vpop.f32.mrf.mxu1  ;;  %v421_v63 = vmax.f32 %v416_v54, %v420_v55 }
 0x11e   : > { %v765_v48 = vadd.f32 %v397_v25, %v341_v39 }
 0x120   : > { %v418_v57 = vsel %vm415_vm2, %v765_v48, -inf }
 0x121   : > { %v406_v24 = vpop.f32.mrf.mxu3 }
 0x122   : > { %v759_v45 = vadd.f32 %v406_v24, %v344_v35 }
 0x124   : > { %v422_v53 = vsel %vm415_vm2, %v759_v45, -inf }
 0x125   : > { %v400_v42 = vpop.f32.mrf.mxu1  ;;  %v423_v61 = vmax.f32 %v417_v52, %v422_v53 }
 0x126   : > { %v769_v50 = vadd.f32 %v400_v42, %v342_v41 }
 0x127   : > { %v428_v2 = vmax.f32 %v421_v63, %v423_v61 }
 0x128   : > { %v419_v59 = vsel %vm415_vm2, %v769_v50, -inf }
 0x129   : > { %v409_v38 = vpop.f32.mrf.mxu3 }
 0x12a   : > { %v767_v49 = vadd.f32 %v409_v38, %v345_v40 }
 0x12c   : > { %v424_v58 = vsel %vm415_vm2, %v767_v49, -inf }
 0x12d   : > { %v425_v0 = vmax.f32 %v418_v57, %v424_v58 }
 0x131   : > { %v412_v56 = vpop.f32.mrf.mxu3 }
 0x132   : > { %v785_v60 = vadd.f32 %v412_v56, %v346_v51 }
 0x134   : > { %v426_v62 = vsel %vm415_vm2, %v785_v60, -inf }
 0x135   : > { %v427_v1 = vmax.f32 %v419_v59, %v426_v62 }
 0x137   : > { %v429_v3 = vmax.f32 %v425_v0, %v427_v1 }
 0x139   : > { %v430_v4 = vmax.f32 %v428_v2, %v429_v3 }
 0x13b   : > { %431 = vmax.xlane.f32.xlu0 %v430_v4 }
 0x1ae   : > { %v432_v5 = vpop.xlane.xlu0 %431 }
 0x1af   : > { %v433_v6 = vrot.slane %v432_v5, 4 }
 0x1b1   : > { %v434_v7 = vmax.f32 %v432_v5, %v433_v6 }
 0x1b3   : > { %v435_v8 = vrot.slane %v434_v7, 2 }
 0x1b5   : > { %v436_v9 = vmax.f32 %v434_v7, %v435_v8 }
 0x1b7   : > { %v437_v10 = vrot.slane %v436_v9, 1 }
 0x1b9   : > { %v438_v11 = vmax.f32 %v436_v9, %v437_v10 }
 0x1bb   : > { %613 = vpush %v438_v11 }
 0x1ec   : > { %s789_s23 = spop %613 }
 0x1ed   : > { %v440_v12 = vstv %s789_s23 }
 0x1ee   : > { %v441_v13 = vsub.f32 %v761_v46, %v440_v12  ;;  %v442_v14 = vsub.f32 %v757_v44, %v440_v12  ;;  %v443_v15 = vsub.f32 %v765_v48, %v440_v12  ;;  %v444_v16 = vsub.f32 %v769_v50, %v440_v12 }
 0x1ef   : > { %v445_v17 = vsub.f32 %v763_v47, %v440_v12  ;;  %v446_v21 = vsub.f32 %v759_v45, %v440_v12  ;;  %v447_v23 = vsub.f32 %v767_v49, %v440_v12  ;;  %v448_v25 = vsub.f32 %v785_v60, %v440_v12 }
 0x1f0   : > { %v449_v18 = vmul.f32 1.442695, %v441_v13  ;;  %v451_v19 = vmul.f32 1.442695, %v442_v14  ;;  %v453_v20 = vmul.f32 1.442695, %v443_v15 }
 0x1f1   : > { %v455_v22 = vmul.f32 1.442695, %v444_v16  ;;  %v457_v24 = vmul.f32 1.442695, %v445_v17  ;;  %v459_v26 = vmul.f32 1.442695, %v446_v21 }
 0x1f2   : > { %630 = vpow2.f32 %v449_v18  ;;  %v461_v27 = vmul.f32 1.442695, %v447_v23  ;;  %v463_v30 = vmul.f32 1.442695, %v448_v25 }
 0x1f3   : > { %632 = vpow2.f32 %v451_v19 }
 0x1f4   : > { %634 = vpow2.f32 %v453_v20 }
 0x1f5   : > { %636 = vpow2.f32 %v455_v22 }
 0x1f6   : > { %638 = vpow2.f32 %v457_v24 }
 0x1f7   : > { %640 = vpow2.f32 %v459_v26 }
 0x1f8   : > { %v631_v28 = vpop.eup %630  ;;  %642 = vpow2.f32 %v461_v27 }
 0x1f9   : > { %v633_v29 = vpop.eup %632  ;;  %v465_v31 = vsel %vm415_vm2, %v631_v28, 0.0  ;;  %644 = vpow2.f32 %v463_v30 }
 0x1fa   : > { %v635_v32 = vpop.eup %634  ;;  %v466_v33 = vsel %vm415_vm2, %v633_v29, 0.0 }
 0x1fb   : > { %v637_v34 = vpop.eup %636  ;;  %v467_v35 = vadd.f32 %v466_v33, %v465_v31  ;;  %v468_v36 = vsel %vm415_vm2, %v635_v32, 0.0 }
 0x1fc   : > { %v639_v37 = vpop.eup %638  ;;  %v470_v39 = vsel %vm415_vm2, %v637_v34, 0.0 }
 0x1fd   : > { %v469_v38 = vadd.f32 %v468_v36, %v467_v35  ;;  %v641_v40 = vpop.eup %640  ;;  %v472_v42 = vsel %vm415_vm2, %v639_v37, 0.0 }
 0x1fe   : > { %v643_v43 = vpop.eup %642  ;;  %v474_v52 = vsel %vm415_vm2, %v641_v40, 0.0 }
 0x1ff   : > { %v471_v41 = vadd.f32 %v470_v39, %v469_v38  ;;  %v645_v53 = vpop.eup %644  ;;  %v476_v55 = vsel %vm415_vm2, %v643_v43, 0.0 }
 0x200   : > { %v478_v57 = vsel %vm415_vm2, %v645_v53, 0.0 }
 0x201   : > { %v473_v51 = vadd.f32 %v472_v42, %v471_v41 }
 0x203   : > { %v475_v54 = vadd.f32 %v474_v52, %v473_v51 }
 0x205   : > { %v477_v56 = vadd.f32 %v476_v55, %v475_v54 }
 0x207   : > { %v479_v58 = vadd.f32 %v478_v57, %v477_v56 }
 0x209   : > { %480 = vadd.xlane.f32.xlu1 %v479_v58 }
 0x27c   : > { %v481_v59 = vpop.xlane.xlu1 %480 }
 0x27d   : > { %v482_v61 = vrot.slane %v481_v59, 4 }
 0x27f   : > { %v483_v62 = vadd.f32 %v482_v61, %v481_v59 }
 0x281   : > { %v484_v63 = vrot.slane %v483_v62, 2 }
 0x283   : > { %v485_v0 = vadd.f32 %v484_v63, %v483_v62 }
 0x285   : > { %v486_v1 = vrot.slane %v485_v0, 1 }
 0x287   : > { %v487_v2 = vadd.f32 %v486_v1, %v485_v0 }
 0x289   : > { %615 = vpush %v487_v2 }
 0x2ba   : > { %s616_s24 = spop %615 }
 0x2bb   : > { %v489_v3 = vstv %s616_s24 }
 0x2bc   : > { %646 = vlog2.f32 %v489_v3 }
 0x2c2   : > { %v647_v4 = vpop.eup %646 }
 0x2c3   : > { %v491_v5 = vmul.f32 0.6931472, %v647_v4 }
 0x2c5   : > { %617 = vpush %v491_v5 }
 0x2f6   : > { %s618_s25 = spop %617 }
 0x2f7   : > { %s493_s26 = sadd.f32 %s618_s25, %s789_s23 }
 0x2f9   : > { %s494_s27 = sadd.f32 1.3862944, %s493_s26 }
 0x2fb   : > { %v495_v6 = vstv %s494_s27 }
 0x2fc   : > { %v496_v7 = vsub.f32 %v761_v46, %v495_v6  ;;  %v497_v8 = vsub.f32 %v757_v44, %v495_v6  ;;  %v498_v9 = vsub.f32 %v765_v48, %v495_v6  ;;  %v499_v10 = vsub.f32 %v769_v50, %v495_v6 }
 0x2fd   : > { %v500_v11 = vsub.f32 %v763_v47, %v495_v6  ;;  %v501_v12 = vsub.f32 %v759_v45, %v495_v6  ;;  %v502_v13 = vsub.f32 %v767_v49, %v495_v6  ;;  %v503_v46 = vsub.f32 %v785_v60, %v495_v6 }
 0x2fe   : > { %504 = vst.msk [vmem:[%s243_s30] sm:$0xff] %vm415_vm2, %v496_v7 }
 0x2ff   : > { %505 = vst.msk [vmem:[%s243_s30 + $0x8] sm:$0xff] %vm415_vm2, %v497_v8 }
 0x300   : > { %506 = vst.msk [vmem:[%s243_s30 + $0x10] sm:$0xff] %vm415_vm2, %v498_v9 }
 0x301   : > { %507 = vst.msk [vmem:[%s243_s30 + $0x18] sm:$0xff] %vm415_vm2, %v499_v10 }
 0x302   : > { %508 = vst.msk [vmem:[%s243_s30 + $0x20] sm:$0xff] %vm415_vm2, %v500_v11 }
 0x303   : > { %509 = vst.msk [vmem:[%s243_s30 + $0x28] sm:$0xff] %vm415_vm2, %v501_v12 }
 0x304   : > { %510 = vst.msk [vmem:[%s243_s30 + $0x30] sm:$0xff] %vm415_vm2, %v502_v13 }
 0x305   : > { %511 = vst.msk [vmem:[%s243_s30 + $0x38] sm:$0xff] %vm415_vm2, %v503_v46 }
 0x306 PF: > { %s17_s20 = sadd.s32 1, %s654_s20  }
 0x307   : > { %p14_p4 = scmp.ge.s32.totalorder %s17_s20, 4  }
 0x309   :  { %16 = sbr.rel (!%p14_p4) target bundleno = 3 (0x3), region = 73 }

</bundles_post_ra>
